<compile_context>
chip_gen: v7x
topology: tpu7x:2x2x1
jax: 0.10.0
libtpu: 0.0.40
codegen_flags: <defaults>
</compile_context>

<pallas_src>
import jax
import jax.numpy as jnp
from jax.experimental import pallas as pl
from jax.experimental.pallas import tpu as pltpu


def _round_up(x, m):
    return ((x + m - 1) // m) * m


# ----------------------------------------------------------------------------- kernel
def _gru_seq_kernel(x_ref, h0_ref, wrz_ref, win_ref, whn_ref,
                    brz_ref, bin_ref, bhn_ref, hs_ref, h_scr):
    t = pl.program_id(0)

    @pl.when(t == 0)
    def _():
        h_scr[...] = h0_ref[...]

    h = h_scr[...]                     # (Bp, Hp) f32, carried in VMEM scratch
    x = x_ref[...]                     # (Bp, Ip) f32, this step's input block
    Hp = h.shape[-1]

    xb = x.astype(jnp.bfloat16)
    hb = h.astype(jnp.bfloat16)

    # Merged r/z projection: one MXU matmul, bf16 inputs, f32 accumulate.
    xh = jnp.concatenate([xb, hb], axis=-1)                       # (Bp, Ip+Hp)
    rz = jnp.dot(xh, wrz_ref[...],
                 preferred_element_type=jnp.float32) + brz_ref[...]
    r = jax.nn.sigmoid(rz[:, :Hp])     # 128-lane-aligned slices: no relayout copies
    z = jax.nn.sigmoid(rz[:, Hp:])

    # n-gate: keep input / hidden projections separate (r gates only the hidden part).
    i_n = jnp.dot(xb, win_ref[...], preferred_element_type=jnp.float32)
    h_n = jnp.dot(hb, whn_ref[...], preferred_element_type=jnp.float32)
    n = jnp.tanh(i_n + bin_ref[...] + r * (h_n + bhn_ref[...]))

    h_new = n + z * (h - n)            # = (1 - z) * n + z * h, one fewer vmul
    h_scr[...] = h_new
    hs_ref[...] = h_new.astype(hs_ref.dtype)


# ----------------------------------------------------------------------- param prep
def prepare_gru_params(w_ih, w_hh, b_ih, b_hh, input_size, hidden_size):
    """One-time glue: transpose, pad to (128-lane, 8-sublane) tiles, fold r/z biases,
    cast weights to bf16.  Done once; the per-step path never pays for it."""
    I, H = input_size, hidden_size
    Ip = _round_up(I, 128)
    Hp = _round_up(H, 128)

    w_ir, w_iz, w_in = w_ih[:H], w_ih[H:2 * H], w_ih[2 * H:]
    w_hr, w_hz, w_hn = w_hh[:H], w_hh[H:2 * H], w_hh[2 * H:]
    b_ir, b_iz, b_in = b_ih[:H], b_ih[H:2 * H], b_ih[2 * H:]
    b_hr, b_hz, b_hn = b_hh[:H], b_hh[H:2 * H], b_hh[2 * H:]

    def pad2(m, r, c):
        return jnp.pad(m, ((0, r - m.shape[0]), (0, c - m.shape[1])))

    def pad1(v, n):
        return jnp.pad(v, (0, n - v.shape[0]))

    # Merged r/z weight: rows = [x-block (Ip); h-block (Hp)], cols = [r (Hp) | z (Hp)].
    top = jnp.concatenate([pad2(w_ir.T, Ip, Hp), pad2(w_iz.T, Ip, Hp)], axis=1)
    bot = jnp.concatenate([pad2(w_hr.T, Hp, Hp), pad2(w_hz.T, Hp, Hp)], axis=1)
    w_rz = jnp.concatenate([top, bot], axis=0).astype(jnp.bfloat16)   # (Ip+Hp, 2Hp)

    w_in_t = pad2(w_in.T, Ip, Hp).astype(jnp.bfloat16)                # (Ip, Hp)
    w_hn_t = pad2(w_hn.T, Hp, Hp).astype(jnp.bfloat16)                # (Hp, Hp)

    b_rz = jnp.concatenate(
        [pad1(b_ir + b_hr, Hp), pad1(b_iz + b_hz, Hp)]
    ).reshape(1, 2 * Hp).astype(jnp.float32)
    b_in_p = pad1(b_in, Hp).reshape(1, Hp).astype(jnp.float32)
    b_hn_p = pad1(b_hn, Hp).reshape(1, Hp).astype(jnp.float32)

    return dict(w_rz=w_rz, w_in=w_in_t, w_hn=w_hn_t,
                b_rz=b_rz, b_in=b_in_p, b_hn=b_hn_p,
                I=I, H=H, Ip=Ip, Hp=Hp)


# ------------------------------------------------------------------------- wrappers
def update_nn_forward_seq(xs, h0, params):
    """Apply the GRU update T times with the time loop fused into one Pallas call.

    xs: (T, B, I) f32, h0: (B, H) f32  ->  (T, B, H) f32 (all intermediate hiddens).
    Weights stay VMEM-resident across the whole grid; h is carried in VMEM scratch.
    """
    T, B, I = xs.shape
    H = h0.shape[-1]
    Ip, Hp = params["Ip"], params["Hp"]
    Bp = _round_up(max(B, 8), 8)

    xs_p = jnp.pad(xs.astype(jnp.float32), ((0, 0), (0, Bp - B), (0, Ip - I)))
    h0_p = jnp.pad(h0.astype(jnp.float32), ((0, Bp - B), (0, Hp - H)))

    const2 = lambda t: (0, 0)   # constant block index -> DMA once, stays resident

    hs_p = pl.pallas_call(
        _gru_seq_kernel,
        out_shape=jax.ShapeDtypeStruct((T, Bp, Hp), jnp.float32),
        grid_spec=pltpu.PrefetchScalarGridSpec(
            num_scalar_prefetch=0,
            grid=(T,),
            in_specs=[
                pl.BlockSpec((None, Bp, Ip), lambda t: (t, 0, 0)),   # x_t (streamed)
                pl.BlockSpec((Bp, Hp), const2),                      # h0
                pl.BlockSpec((Ip + Hp, 2 * Hp), const2),             # W_rz  (resident)
                pl.BlockSpec((Ip, Hp), const2),                      # W_in  (resident)
                pl.BlockSpec((Hp, Hp), const2),                      # W_hn  (resident)
                pl.BlockSpec((1, 2 * Hp), const2),                   # b_rz
                pl.BlockSpec((1, Hp), const2),                       # b_in
                pl.BlockSpec((1, Hp), const2),                       # b_hn
            ],
            out_specs=pl.BlockSpec((None, Bp, Hp), lambda t: (t, 0, 0)),
            scratch_shapes=[pltpu.VMEM((Bp, Hp), jnp.float32)],      # carried hidden
        ),
        # Time axis is a true recurrence -> sequential. For large batches on v7x,
        # a leading "parallel" batch-tile axis would engage both TensorCores.
        compiler_params=pltpu.CompilerParams(dimension_semantics=("arbitrary",)),
    )(xs_p, h0_p, params["w_rz"], params["w_in"], params["w_hn"],
      params["b_rz"], params["b_in"], params["b_hn"])

    return hs_p[:, :B, :H]


def update_nn_forward(x, h, params):
    """_UpdateNNBase.forward(input, hidden): a single GRUCell update step."""
    return update_nn_forward_seq(x[None], h, params)[0]


# ------------------------------------------------------------------------ reference
def _reference_seq(xs, h0, w_ih, w_hh, b_ih, b_hh):
    H = h0.shape[-1]

    def step(h, x):
        gi = x @ w_ih.T + b_ih
        gh = h @ w_hh.T + b_hh
        i_r, i_z, i_n = gi[:, :H], gi[:, H:2 * H], gi[:, 2 * H:]
        h_r, h_z, h_n = gh[:, :H], gh[:, H:2 * H], gh[:, 2 * H:]
        r = jax.nn.sigmoid(i_r + h_r)
        z = jax.nn.sigmoid(i_z + h_z)
        n = jnp.tanh(i_n + r * h_n)
        h_new = (1.0 - z) * n + z * h
        return h_new, h_new

    _, hs = jax.lax.scan(step, h0, xs)
    return hs


if __name__ == "__main__":
    # TODO(synk): the inspect-based signature check of the wrapped UpdateNN module is a
    # Python-level validation with no array semantics; not representable in Pallas.
    T, B, I, H = 8, 2, 16, 32

    key = jax.random.PRNGKey(0)
    kx, kh, k1, k2, k3, k4 = jax.random.split(key, 6)

    xs = jax.random.normal(kx, (T, B, I), dtype=jnp.float32)
    h0 = jax.random.normal(kh, (B, H), dtype=jnp.float32)

    # GRUCell-style init: U(-1/sqrt(H), 1/sqrt(H)).
    bound = 1.0 / jnp.sqrt(jnp.float32(H))
    w_ih = jax.random.uniform(k1, (3 * H, I), jnp.float32, -bound, bound)
    w_hh = jax.random.uniform(k2, (3 * H, H), jnp.float32, -bound, bound)
    b_ih = jax.random.uniform(k3, (3 * H,), jnp.float32, -bound, bound)
    b_hh = jax.random.uniform(k4, (3 * H,), jnp.float32, -bound, bound)

    params = prepare_gru_params(w_ih, w_hh, b_ih, b_hh, I, H)

    # Single-step call (matches _UpdateNNBase.forward(input, hidden)).
    h1 = jax.block_until_ready(update_nn_forward(xs[0], h0, params))

    # Fused multi-step call (time loop inside the kernel, weights VMEM-resident).
    hs = jax.block_until_ready(update_nn_forward_seq(xs, h0, params))

    hs_ref = _reference_seq(xs, h0, w_ih, w_hh, b_ih, b_hh)

    assert h1.shape == (B, H)
    assert hs.shape == (T, B, H)
    # bf16 MXU inputs (f32 accumulation) -> slightly relaxed tolerance vs f32 reference.
    assert jnp.allclose(h1, hs_ref[0], atol=2e-2, rtol=2e-2)
    assert jnp.allclose(hs, hs_ref, atol=2e-2, rtol=2e-2)

    print("KERNEL_OK")
</pallas_src>

<mosaic_0001>
module attributes {stable_mosaic.version = 11 : i64} {
  func.func @_gru_seq_kernel(%arg0: i32, %arg1: memref<1x8x128xf32, #tpu.memory_space<vmem>>, %arg2: memref<8x128xf32, #tpu.memory_space<vmem>>, %arg3: memref<256x256xbf16, #tpu.memory_space<vmem>>, %arg4: memref<128x128xbf16, #tpu.memory_space<vmem>>, %arg5: memref<128x128xbf16, #tpu.memory_space<vmem>>, %arg6: memref<1x256xf32, #tpu.memory_space<vmem>>, %arg7: memref<1x128xf32, #tpu.memory_space<vmem>>, %arg8: memref<1x128xf32, #tpu.memory_space<vmem>>, %arg9: memref<1x8x128xf32, #tpu.memory_space<vmem>>, %arg10: memref<8x128xf32, #tpu.memory_space<vmem>>) attributes {dimension_semantics = [#tpu.dimension_semantics<arbitrary>], iteration_bounds = array<i64: 1>, scalar_prefetch = 0 : i64, scratch_operands = 1 : i64, tpu.core_type = #tpu.core_type<tc>, window_params = [{transform_indices = @transform_0, window_bounds = array<i64: 1, 8, 128>}, {pipeline_mode = #tpu.pipeline_mode<synchronous>, transform_indices = @transform_1, window_bounds = array<i64: 8, 128>}, {pipeline_mode = #tpu.pipeline_mode<synchronous>, transform_indices = @transform_2, window_bounds = array<i64: 256, 256>}, {pipeline_mode = #tpu.pipeline_mode<synchronous>, transform_indices = @transform_3, window_bounds = array<i64: 128, 128>}, {pipeline_mode = #tpu.pipeline_mode<synchronous>, transform_indices = @transform_4, window_bounds = array<i64: 128, 128>}, {pipeline_mode = #tpu.pipeline_mode<synchronous>, transform_indices = @transform_5, window_bounds = array<i64: 1, 256>}, {pipeline_mode = #tpu.pipeline_mode<synchronous>, transform_indices = @transform_6, window_bounds = array<i64: 1, 128>}, {pipeline_mode = #tpu.pipeline_mode<synchronous>, transform_indices = @transform_7, window_bounds = array<i64: 1, 128>}, {transform_indices = @transform_8, window_bounds = array<i64: 1, 8, 128>}]} {
    %c0_i32 = arith.constant 0 : i32
    %0 = arith.cmpi eq, %arg0, %c0_i32 : i32
    %1 = arith.extui %0 : i1 to i32
    %c0_i32_0 = arith.constant 0 : i32
    %2 = arith.cmpi ne, %1, %c0_i32_0 : i32
    scf.if %2 {
      %c0_26 = arith.constant 0 : index
      %c0_27 = arith.constant 0 : index
      %46 = vector.load %arg2[%c0_26, %c0_27] : memref<8x128xf32, #tpu.memory_space<vmem>>, vector<8x128xf32>
      %c0_28 = arith.constant 0 : index
      %c0_29 = arith.constant 0 : index
      %47 = vector.load %arg10[%c0_28, %c0_29] : memref<8x128xf32, #tpu.memory_space<vmem>>, vector<8x128xf32>
      tpu.vector_store %arg10[%c0_28, %c0_29], %46 {strides = array<i32>} : memref<8x128xf32, #tpu.memory_space<vmem>>, vector<8x128xf32>,
    } else {
    }
    %c0 = arith.constant 0 : index
    %c0_1 = arith.constant 0 : index
    %3 = vector.load %arg10[%c0, %c0_1] : memref<8x128xf32, #tpu.memory_space<vmem>>, vector<8x128xf32>
    %c0_2 = arith.constant 0 : index
    %c0_3 = arith.constant 0 : index
    %c0_4 = arith.constant 0 : index
    %4 = vector.load %arg1[%c0_2, %c0_3, %c0_4] : memref<1x8x128xf32, #tpu.memory_space<vmem>>, vector<1x8x128xf32>
    %5 = vector.shape_cast %4 : vector<1x8x128xf32> to vector<8x128xf32>
    %6 = arith.truncf %5 : vector<8x128xf32> to vector<8x128xbf16>
    %7 = arith.truncf %3 : vector<8x128xf32> to vector<8x128xbf16>
    %8 = tpu.concatenate %6, %7 in 1 : vector<8x128xbf16>, vector<8x128xbf16> -> vector<8x256xbf16>
    %c0_5 = arith.constant 0 : index
    %c0_6 = arith.constant 0 : index
    %9 = vector.load %arg3[%c0_5, %c0_6] : memref<256x256xbf16, #tpu.memory_space<vmem>>, vector<256x256xbf16>
    %cst = arith.constant dense<0.000000e+00> : vector<8x256xf32>
    %10 = tpu.matmul %8, %9, %cst {dimension_numbers = #tpu.dot_dimension_numbers<[1], [0], [0], [1], [0, 0, 1, 1], [], []>} : vector<8x256xbf16>, vector<256x256xbf16>, vector<8x256xf32> -> vector<8x256xf32>
    %c0_7 = arith.constant 0 : index
    %c0_8 = arith.constant 0 : index
    %11 = vector.load %arg6[%c0_7, %c0_8] : memref<1x256xf32, #tpu.memory_space<vmem>>, vector<1x256xf32>
    %12 = vector.broadcast %11 : vector<1x256xf32> to vector<8x256xf32>
    %13 = arith.addf %10, %12 : vector<8x256xf32>
    %14 = vector.extract_strided_slice %13 {offsets = [0, 0], sizes = [8, 128], strides = [1, 1]} : vector<8x256xf32> to vector<8x128xf32>
    %15 = arith.negf %14 : vector<8x128xf32>
    %16 = math.exp %15 : vector<8x128xf32>
    %cst_9 = arith.constant 1.000000e+00 : f32
    %17 = vector.broadcast %cst_9 : f32 to vector<8x128xf32>
    %18 = arith.addf %17, %16 : vector<8x128xf32>
    %19 = arith.divf %17, %18 : vector<8x128xf32>
    %20 = vector.extract_strided_slice %13 {offsets = [0, 128], sizes = [8, 128], strides = [1, 1]} : vector<8x256xf32> to vector<8x128xf32>
    %21 = arith.negf %20 : vector<8x128xf32>
    %22 = math.exp %21 : vector<8x128xf32>
    %cst_10 = arith.constant 1.000000e+00 : f32
    %23 = vector.broadcast %cst_10 : f32 to vector<8x128xf32>
    %24 = arith.addf %23, %22 : vector<8x128xf32>
    %25 = arith.divf %23, %24 : vector<8x128xf32>
    %c0_11 = arith.constant 0 : index
    %c0_12 = arith.constant 0 : index
    %26 = vector.load %arg4[%c0_11, %c0_12] : memref<128x128xbf16, #tpu.memory_space<vmem>>, vector<128x128xbf16>
    %cst_13 = arith.constant dense<0.000000e+00> : vector<8x128xf32>
    %27 = tpu.matmul %6, %26, %cst_13 {dimension_numbers = #tpu.dot_dimension_numbers<[1], [0], [0], [1], [0, 0, 1, 1], [], []>} : vector<8x128xbf16>, vector<128x128xbf16>, vector<8x128xf32> -> vector<8x128xf32>
    %c0_14 = arith.constant 0 : index
    %c0_15 = arith.constant 0 : index
    %28 = vector.load %arg5[%c0_14, %c0_15] : memref<128x128xbf16, #tpu.memory_space<vmem>>, vector<128x128xbf16>
    %cst_16 = arith.constant dense<0.000000e+00> : vector<8x128xf32>
    %29 = tpu.matmul %7, %28, %cst_16 {dimension_numbers = #tpu.dot_dimension_numbers<[1], [0], [0], [1], [0, 0, 1, 1], [], []>} : vector<8x128xbf16>, vector<128x128xbf16>, vector<8x128xf32> -> vector<8x128xf32>
    %c0_17 = arith.constant 0 : index
    %c0_18 = arith.constant 0 : index
    %30 = vector.load %arg7[%c0_17, %c0_18] : memref<1x128xf32, #tpu.memory_space<vmem>>, vector<1x128xf32>
    %31 = vector.broadcast %30 : vector<1x128xf32> to vector<8x128xf32>
    %32 = arith.addf %27, %31 : vector<8x128xf32>
    %c0_19 = arith.constant 0 : index
    %c0_20 = arith.constant 0 : index
    %33 = vector.load %arg8[%c0_19, %c0_20] : memref<1x128xf32, #tpu.memory_space<vmem>>, vector<1x128xf32>
    %34 = vector.broadcast %33 : vector<1x128xf32> to vector<8x128xf32>
    %35 = arith.addf %29, %34 : vector<8x128xf32>
    %36 = arith.mulf %19, %35 : vector<8x128xf32>
    %37 = arith.addf %32, %36 : vector<8x128xf32>
    %38 = math.tanh %37 : vector<8x128xf32>
    %39 = arith.subf %3, %38 : vector<8x128xf32>
    %40 = arith.mulf %25, %39 : vector<8x128xf32>
    %41 = arith.addf %38, %40 : vector<8x128xf32>
    %c0_21 = arith.constant 0 : index
    %c0_22 = arith.constant 0 : index
    %42 = vector.load %arg10[%c0_21, %c0_22] : memref<8x128xf32, #tpu.memory_space<vmem>>, vector<8x128xf32>
    tpu.vector_store %arg10[%c0_21, %c0_22], %41 {strides = array<i32>} : memref<8x128xf32, #tpu.memory_space<vmem>>, vector<8x128xf32>,
    %c0_23 = arith.constant 0 : index
    %c0_24 = arith.constant 0 : index
    %c0_25 = arith.constant 0 : index
    %43 = vector.load %arg9[%c0_23, %c0_24, %c0_25] : memref<1x8x128xf32, #tpu.memory_space<vmem>>, vector<1x8x128xf32>
    %44 = vector.shape_cast %43 : vector<1x8x128xf32> to vector<8x128xf32>
    %45 = vector.shape_cast %41 : vector<8x128xf32> to vector<1x8x128xf32>
    tpu.vector_store %arg9[%c0_23, %c0_24, %c0_25], %45 {strides = array<i32>} : memref<1x8x128xf32, #tpu.memory_space<vmem>>, vector<1x8x128xf32>,
    return
  }
  func.func @transform_0(%arg0: i32) -> (i32, i32, i32) {
    %c0_i32 = arith.constant 0 : i32
    %c0_i32_0 = arith.constant 0 : i32
    %c0_i32_1 = arith.constant 0 : i32
    return %arg0, %c0_i32, %c0_i32_0 : i32, i32, i32
  }
  func.func @transform_1(%arg0: i32) -> (i32, i32) {
    %c0_i32 = arith.constant 0 : i32
    %c0_i32_0 = arith.constant 0 : i32
    %c0_i32_1 = arith.constant 0 : i32
    return %c0_i32, %c0_i32_0 : i32, i32
  }
  func.func @transform_2(%arg0: i32) -> (i32, i32) {
    %c0_i32 = arith.constant 0 : i32
    %c0_i32_0 = arith.constant 0 : i32
    %c0_i32_1 = arith.constant 0 : i32
    return %c0_i32, %c0_i32_0 : i32, i32
  }
  func.func @transform_3(%arg0: i32) -> (i32, i32) {
    %c0_i32 = arith.constant 0 : i32
    %c0_i32_0 = arith.constant 0 : i32
    %c0_i32_1 = arith.constant 0 : i32
    return %c0_i32, %c0_i32_0 : i32, i32
  }
  func.func @transform_4(%arg0: i32) -> (i32, i32) {
    %c0_i32 = arith.constant 0 : i32
    %c0_i32_0 = arith.constant 0 : i32
    %c0_i32_1 = arith.constant 0 : i32
    return %c0_i32, %c0_i32_0 : i32, i32
  }
  func.func @transform_5(%arg0: i32) -> (i32, i32) {
    %c0_i32 = arith.constant 0 : i32
    %c0_i32_0 = arith.constant 0 : i32
    %c0_i32_1 = arith.constant 0 : i32
    return %c0_i32, %c0_i32_0 : i32, i32
  }
  func.func @transform_6(%arg0: i32) -> (i32, i32) {
    %c0_i32 = arith.constant 0 : i32
    %c0_i32_0 = arith.constant 0 : i32
    %c0_i32_1 = arith.constant 0 : i32
    return %c0_i32, %c0_i32_0 : i32, i32
  }
  func.func @transform_7(%arg0: i32) -> (i32, i32) {
    %c0_i32 = arith.constant 0 : i32
    %c0_i32_0 = arith.constant 0 : i32
    %c0_i32_1 = arith.constant 0 : i32
    return %c0_i32, %c0_i32_0 : i32, i32
  }
  func.func @transform_8(%arg0: i32) -> (i32, i32, i32) {
    %c0_i32 = arith.constant 0 : i32
    %c0_i32_0 = arith.constant 0 : i32
    %c0_i32_1 = arith.constant 0 : i32
    return %arg0, %c0_i32, %c0_i32_0 : i32, i32, i32
  }
}

</mosaic_0001>

<bundles_post_ra>
// kernel: tpu_custom_call.1
= control target key start
LH: loop header
LB: loop body
LE: loop exit
PB: predicated region body
PF: predicated region fallthrough
CT: control target
= control target key end

     0   :  { %13 = vsyncpa [#allocation4], 0  ;;  %s1128_s0 = inlined_call_operand.hbm [shape: f32[1,8,128], index: 0, kind: input, shape index: {}]   ;;  %s1129_s1 = inlined_call_operand.hbm [shape: f32[8,128], index: 1, kind: input, shape index: {}]   ;;  %s1130_s2 = inlined_call_operand.hbm [shape: bf16[256,256], index: 2, kind: input, shape index: {}]   ;;  %s1131_s3 = inlined_call_operand.hbm [shape: bf16[128,128], index: 3, kind: input, shape index: {}]   ;;  %s1132_s4 = inlined_call_operand.hbm [shape: bf16[128,128], index: 4, kind: input, shape index: {}]   ;;  %s1133_s5 = inlined_call_operand.vmem [shape: f32[1,256], index: 5, kind: input, shape index: {}]   ;;  %s1134_s6 = inlined_call_operand.vmem [shape: f32[1,128], index: 6, kind: input, shape index: {}]   ;;  %s1135_s7 = inlined_call_operand.vmem [shape: f32[1,128], index: 7, kind: input, shape index: {}]   ;;  %s1136_s8 = inlined_call_operand.hbm [shape: f32[1,8,128], index: 8, kind: output, shape index: {}]  }
   0x1   :  { %14 = vsyncpa [#allocation7], 0 }
   0x2   :  { %15 = vsyncpa [#allocation10], 0 }
   0x3   :  { %16 = vsyncpa [#allocation5], 0  ;;  %s945_s27 = smov [#allocation6]   ;;  %s946_s29 = smov [#allocation9]  }
   0x4   :  { %s33_s28 = sshll.u32 %s945_s27, 4  ;;  %s54_s30 = sshll.u32 %s946_s29, 4  ;;  %s34_s28 = int_to_ptr.vmem [resolvable:$true] %s33_s28  ;;  %s1002_s30 = int_to_ptr.vmem [resolvable:$true] %s54_s30 }
   0x5   :  { %s805_s11 = scalar_lea.hbm %s1129_s1, 128 }
   0x6   :  { %p806_p0 = scmp.ne.s32.totalorder %s1129_s1, %s805_s11  ;;  %p809_p1 = scmp.lt.u32.totalorder %s805_s11, %s1129_s1 }
   0x8   :  { %p811_p2 = pnand %p809_p1, %p806_p0 }
   0xa   :  { %814 = shalt.err (!%p811_p2)
}
   0xb   :  { %s815_s16 = scalar_lea.vmem %s34_s28, 128  ;;  %p820_p4 = scmp.lt.s32.totalorder %s34_s28, %s34_s28 }
   0xc   :  { %p816_p3 = scmp.ne.s32.totalorder %s34_s28, %s815_s16  ;;  %p821_p5 = scmp.lt.s32.totalorder %s815_s16, %s815_s16 }
   0xe   :  { %p822_p6 = por %p821_p5, %p820_p4 }
  0x10   :  { %p823_p7 = pnand %p822_p6, %p816_p3 }
  0x12   :  { %826 = shalt.err (!%p823_p7)
}
  0x13   :  { %36 = dma.hbm_to_vmem [thread:$0]  %s1129_s1, 128, %s34_s28, [#allocation7]  }
  0x14   :  { %s827_s21 = scalar_lea.hbm %s1131_s3, 1024 }
  0x15   :  { %p828_p8 = scmp.ne.s32.totalorder %s1131_s3, %s827_s21  ;;  %p831_p9 = scmp.lt.u32.totalorder %s827_s21, %s1131_s3 }
  0x17   :  { %p833_p10 = pnand %p831_p9, %p828_p8 }
  0x19   :  { %836 = shalt.err (!%p833_p10)
}
  0x1a   :  { %s837_s26 = scalar_lea.vmem %s1002_s30, 1024  ;;  %p842_p12 = scmp.lt.s32.totalorder %s1002_s30, %s1002_s30 }
  0x1b   :  { %p838_p11 = scmp.ne.s32.totalorder %s1002_s30, %s837_s26  ;;  %p843_p13 = scmp.lt.s32.totalorder %s837_s26, %s837_s26 }
  0x1d   :  { %p844_p0 = por %p843_p13, %p842_p12 }
  0x1f   :  { %p845_p1 = pnand %p844_p0, %p838_p11 }
  0x21   :  { %848 = shalt.err (!%p845_p1)
}
  0x22   :  { %s947_s1 = smov 64   ;;  %s948_s27 = smov 4  }
  0x23   :  { %60 = dma.hbm_to_vmem [thread:$0]  %s1131_s3, 1024, %s1002_s30, [#allocation10], %s947_s1, %s947_s1, %s948_s27  }
  0x24   :  { %s949_s9 = smov [#allocation3]   ;;  %s950_s11 = smov [#allocation8]  }
  0x25   :  { %s23_s10 = sshll.u32 %s949_s9, 4  ;;  %s42_s12 = sshll.u32 %s950_s11, 4  ;;  %s24_s10 = int_to_ptr.vmem [resolvable:$true] %s23_s10  ;;  %s1036_s12 = int_to_ptr.vmem [resolvable:$true] %s42_s12 }
  0x26   :  { %s849_s15 = scalar_lea.hbm %s1128_s0, 128 }
  0x27   :  { %p850_p2 = scmp.ne.s32.totalorder %s1128_s0, %s849_s15  ;;  %p853_p3 = scmp.lt.u32.totalorder %s849_s15, %s1128_s0 }
  0x29   :  { %p855_p4 = pnand %p853_p3, %p850_p2 }
  0x2b   :  { %858 = shalt.err (!%p855_p4)
}
  0x2c   :  { %s859_s3 = scalar_lea.vmem %s24_s10, 128  ;;  %p864_p6 = scmp.lt.s32.totalorder %s24_s10, %s24_s10 }
  0x2d   :  { %p860_p5 = scmp.ne.s32.totalorder %s24_s10, %s859_s3  ;;  %p865_p7 = scmp.lt.s32.totalorder %s859_s3, %s859_s3 }
  0x2f   :  { %p866_p8 = por %p865_p7, %p864_p6 }
  0x31   :  { %p867_p9 = pnand %p866_p8, %p860_p5 }
  0x33   :  { %870 = shalt.err (!%p867_p9)
}
  0x34   :  { %26 = dma.hbm_to_vmem [thread:$0]  %s1128_s0, 128, %s24_s10, [#allocation4]  }
  0x35   :  { %s871_s23 = scalar_lea.hbm %s1130_s2, 4096 }
  0x36   :  { %p872_p10 = scmp.ne.s32.totalorder %s1130_s2, %s871_s23  ;;  %p875_p11 = scmp.lt.u32.totalorder %s871_s23, %s1130_s2 }
  0x38   :  { %p877_p12 = pnand %p875_p11, %p872_p10 }
  0x3a   :  { %880 = shalt.err (!%p877_p12)
}
  0x3b   :  { %s881_s29 = scalar_lea.vmem %s1036_s12, 4096  ;;  %p886_p0 = scmp.lt.s32.totalorder %s1036_s12, %s1036_s12 }
  0x3c   :  { %p882_p13 = scmp.ne.s32.totalorder %s1036_s12, %s881_s29  ;;  %p887_p1 = scmp.lt.s32.totalorder %s881_s29, %s881_s29 }
  0x3e   :  { %p888_p2 = por %p887_p1, %p886_p0 }
  0x40   :  { %p889_p3 = pnand %p888_p2, %p882_p13 }
  0x42   :  { %892 = shalt.err (!%p889_p3)
}
  0x43   :  { %s951_s0 = smov 128   ;;  %s952_s9 = smov 8  }
  0x44   :  { %48 = dma.hbm_to_vmem [thread:$0]  %s1130_s2, 4096, %s1036_s12, [#allocation7], %s951_s0, %s951_s0, %s952_s9  }
  0x45   :  { %s953_s13 = smov [#allocation11]   ;;  %s893_s17 = scalar_lea.hbm %s1132_s4, 1024 }
  0x46   :  { %s66_s14 = sshll.u32 %s953_s13, 4  ;;  %p894_p4 = scmp.ne.s32.totalorder %s1132_s4, %s893_s17  ;;  %s67_s14 = int_to_ptr.vmem [resolvable:$true] %s66_s14 }
  0x47   :  { %p897_p5 = scmp.lt.u32.totalorder %s893_s17, %s1132_s4 }
  0x49   :  { %p899_p6 = pnand %p897_p5, %p894_p4 }
  0x4b   :  { %902 = shalt.err (!%p899_p6)
}
  0x4c   :  { %s903_s20 = scalar_lea.vmem %s67_s14, 1024  ;;  %p908_p8 = scmp.lt.s32.totalorder %s67_s14, %s67_s14 }
  0x4d   :  { %p904_p7 = scmp.ne.s32.totalorder %s67_s14, %s903_s20  ;;  %p909_p9 = scmp.lt.s32.totalorder %s903_s20, %s903_s20 }
  0x4f   :  { %p910_p10 = por %p909_p9, %p908_p8 }
  0x51   :  { %p911_p11 = pnand %p910_p10, %p904_p7 }
  0x53   :  { %914 = shalt.err (!%p911_p11)
}
  0x54   :  { %72 = dma.hbm_to_vmem [thread:$0]  %s1132_s4, 1024, %s67_s14, [#allocation10], %s947_s1, %s947_s1, %s948_s27  }
  0x55   :  { %937 = dma.done.wait [#allocation4], 128  }
  0x56   :  { %938 = vsyncadd [#allocation4], 4294967168 }
  0x57   :  { %939 = dma.done.wait [#allocation7], 4224  }
  0x58   :  { %940 = vsyncadd [#allocation7], 4294963072 }
  0x59   :  { %941 = dma.done.wait [#allocation10], 2048  }
  0x5a   :  { %942 = vsyncadd [#allocation10], 4294965248  ;;  %v954_v0 = vmov 0.0   ;;  %vm955_vm0 = vmmov 0   ;;  %v731_v1 = vld [vmem:[#allocation8 + $0x4] ss:$8 sps:$4 sm:$0xff]   ;;  %v139_v57 = vlaneseq }
  0x5b   :  { %679 = vmatprep.subr.bf16.mxu1 %v954_v0  ;;  %695 = vmatprep.mubr.msk.bf16.mxu1 %vm955_vm0, %v954_v0  ;;  %v733_v2 = vld [vmem:[#allocation8] ss:$8 sps:$4 sm:$0xff]   ;;  %v734_v3 = vld [vmem:[#allocation8 + $0x14] ss:$8 sps:$4 sm:$0xff]   ;;  %v736_v4 = vld [vmem:[#allocation8 + $0x10] ss:$8 sps:$4 sm:$0xff]  }
  0x5c   :  { %309 = vmatprep.subr.bf16.mxu0 %v731_v1  ;;  %v737_v5 = vld [vmem:[#allocation8 + $0x24] ss:$8 sps:$4 sm:$0xff]   ;;  %v739_v6 = vld [vmem:[#allocation8 + $0x20] ss:$8 sps:$4 sm:$0xff]   ;;  %v740_v7 = vld [vmem:[#allocation8 + $0x34] ss:$8 sps:$4 sm:$0xff]  }
  0x5d   :  { %310 = vmatpush1.bf16.msra.mxu0 %v733_v2  ;;  %v751_v8 = vld [vmem:[#allocation9] sm:$0xff]   ;;  %v742_v9 = vld [vmem:[#allocation8 + $0x30] ss:$8 sps:$4 sm:$0xff]   ;;  %v755_v11 = vld [vmem:[#allocation9 + $0x8] sm:$0xff]   ;;  %v140_v58 = vshrl.u32 %v139_v57, 7  ;;  %s956_s23 = smov [#allocation12]  }
  0x5e   :  { %311 = vmatprep.subr.bf16.mxu0 %v734_v3  ;;  %680 = vmatpush3.bf16.msra.mxu1 %v751_v8  ;;  %v743_v10 = vld [vmem:[#allocation8 + $0x44] ss:$8 sps:$4 sm:$0xff]   ;;  %v745_v12 = vld [vmem:[#allocation8 + $0x40] ss:$8 sps:$4 sm:$0xff]   ;;  %v759_v13 = vld [vmem:[#allocation9 + $0x10] sm:$0xff]   ;;  %s598_s24 = sshll.u32 %s956_s23, 4  ;;  %s599_s24 = int_to_ptr.vmem [resolvable:$true] %s598_s24 }
  0x5f   :  { %681 = vmatprep.subr.bf16.mxu1 %v954_v0  ;;  %v746_v14 = vld [vmem:[#allocation8 + $0x54] ss:$8 sps:$4 sm:$0xff]   ;;  %v748_v15 = vld [vmem:[#allocation8 + $0x50] ss:$8 sps:$4 sm:$0xff]   ;;  %v749_v17 = vld [vmem:[#allocation8 + $0x64] ss:$8 sps:$4 sm:$0xff]   ;;  %p920_p13 = scmp.lt.s32.totalorder %s599_s24, %s599_s24 }
  0x60   :  { %v763_v16 = vld [vmem:[#allocation9 + $0x18] sm:$0xff]   ;;  %v752_v18 = vld [vmem:[#allocation8 + $0x60] ss:$8 sps:$4 sm:$0xff]   ;;  %v757_v23 = vld [vmem:[#allocation8 + $0x84] ss:$8 sps:$4 sm:$0xff]   ;;  %v141_v59 = vsub.s32 0, %v140_v58 }
  0x61   :  { %312 = vmatpush1.bf16.msra.mxu0 %v736_v4  ;;  %v767_v19 = vld [vmem:[#allocation9 + $0x20] sm:$0xff]   ;;  %v753_v20 = vld [vmem:[#allocation8 + $0x74] ss:$8 sps:$4 sm:$0xff]   ;;  %v756_v21 = vld [vmem:[#allocation8 + $0x70] ss:$8 sps:$4 sm:$0xff]   ;;  %v145_v1 = vsub.s32 1, %v140_v58 }
  0x62   :  { %313 = vmatprep.subr.bf16.mxu0 %v737_v5  ;;  %682 = vmatpush3.bf16.msra.mxu1 %v755_v11  ;;  %v771_v22 = vld [vmem:[#allocation9 + $0x28] sm:$0xff]   ;;  %v775_v25 = vld [vmem:[#allocation9 + $0x30] sm:$0xff]   ;;  %v1090_v26 = vld [vmem:[#allocation6] sm:$0xff] }
  0x63   :  { %683 = vmatprep.subr.bf16.mxu1 %v954_v0  ;;  %v760_v24 = vld [vmem:[#allocation8 + $0x80] ss:$8 sps:$4 sm:$0xff]   ;;  %v761_v27 = vld [vmem:[#allocation8 + $0x94] ss:$8 sps:$4 sm:$0xff]   ;;  %v104_v28 = vpack.c.bf16 %v1090_v26, %v1090_v26  ;;  %v764_v29 = vld [vmem:[#allocation8 + $0x90] ss:$8 sps:$4 sm:$0xff]  }
  0x64   :  { %v779_v30 = vld [vmem:[#allocation9 + $0x38] sm:$0xff]   ;;  %v102_v31 = vld [vmem:[#allocation3] sm:$0xff]  ;;  %v765_v32 = vld [vmem:[#allocation8 + $0xa4] ss:$8 sps:$4 sm:$0xff]  }
  0x65   :  { %314 = vmatpush1.bf16.msra.mxu0 %v739_v6  ;;  %341 = vmatprep.mubr.bf16.mxu0 %v104_v28  ;;  %v103_v33 = vpack.c.bf16 %v102_v31, %v102_v31  ;;  %v768_v34 = vld [vmem:[#allocation8 + $0xa0] ss:$8 sps:$4 sm:$0xff]   ;;  %v769_v36 = vld [vmem:[#allocation8 + $0xb4] ss:$8 sps:$4 sm:$0xff]   ;;  %v772_v37 = vld [vmem:[#allocation8 + $0xb0] ss:$8 sps:$4 sm:$0xff]  }
  0x66   :  { %315 = vmatprep.subr.bf16.mxu0 %v740_v7  ;;  %684 = vmatpush3.bf16.msra.mxu1 %v759_v13  ;;  %v783_v35 = vld [vmem:[#allocation11] sm:$0xff]   ;;  %v787_v38 = vld [vmem:[#allocation11 + $0x8] sm:$0xff]   ;;  %v789_v41 = vld [vmem:[#allocation11 + $0x10] sm:$0xff]  }
  0x67   :  { %685 = vmatprep.subr.bf16.mxu1 %v954_v0  ;;  %v773_v39 = vld [vmem:[#allocation8 + $0xc4] ss:$8 sps:$4 sm:$0xff]   ;;  %v776_v40 = vld [vmem:[#allocation8 + $0xc0] ss:$8 sps:$4 sm:$0xff]   ;;  %v777_v42 = vld [vmem:[#allocation8 + $0xd4] ss:$8 sps:$4 sm:$0xff]  }
  0x68   :  { %v780_v43 = vld [vmem:[#allocation8 + $0xd0] ss:$8 sps:$4 sm:$0xff]   ;;  %v781_v45 = vld [vmem:[#allocation8 + $0xe4] ss:$8 sps:$4 sm:$0xff]   ;;  %v784_v46 = vld [vmem:[#allocation8 + $0xe0] ss:$8 sps:$4 sm:$0xff]  }
  0x69   :  { %316 = vmatpush1.bf16.msra.mxu0 %v742_v9  ;;  %v790_v44 = vld [vmem:[#allocation11 + $0x18] sm:$0xff]   ;;  %v791_v47 = vld [vmem:[#allocation11 + $0x20] sm:$0xff]   ;;  %v792_v50 = vld [vmem:[#allocation11 + $0x28] sm:$0xff]  }
  0x6a   :  { %317 = vmatprep.subr.bf16.mxu0 %v743_v10  ;;  %686 = vmatpush3.bf16.msra.mxu1 %v763_v16  ;;  %v785_v48 = vld [vmem:[#allocation8 + $0xf4] ss:$8 sps:$4 sm:$0xff]   ;;  %v788_v49 = vld [vmem:[#allocation8 + $0xf0] ss:$8 sps:$4 sm:$0xff]  }
  0x6b   :  { %687 = vmatprep.subr.bf16.mxu1 %v954_v0  ;;  %v793_v51 = vld [vmem:[#allocation11 + $0x30] sm:$0xff]   ;;  %v794_v52 = vld [vmem:[#allocation11 + $0x38] sm:$0xff]  }
  0x6c   :  { %v137_v60 = vld [vmem:[%s1133_s5] sm:$0x3] }
  0x6d   :  { %318 = vmatpush1.bf16.msra.mxu0 %v745_v12  ;;  %v142_v61 = vrot.slane %v137_v60, %v141_v59  ;;  %v146_v5 = vrot.slane %v137_v60, %v145_v1  ;;  %v643_v16 = vld [vmem:[%s1134_s6] ss:$0 sm:$0xff] }
  0x6e   :  { %319 = vmatprep.subr.bf16.mxu0 %v746_v14  ;;  %688 = vmatpush3.bf16.msra.mxu1 %v767_v19  ;;  %v652_v14 = vld [vmem:[%s1135_s7] ss:$0 sm:$0xff]  ;;  %s915_s7 = scalar_lea.vmem %s599_s24, 128 }
  0x6f   :  { %689 = vmatprep.subr.bf16.mxu1 %v954_v0  ;;  %p916_p12 = scmp.ne.s32.totalorder %s599_s24, %s915_s7  ;;  %p921_p0 = scmp.lt.s32.totalorder %s915_s7, %s915_s7 }
  0x71   :  { %320 = vmatpush1.bf16.msra.mxu0 %v748_v15  ;;  %p922_p1 = por %p921_p0, %p920_p13 }
  0x72   :  { %321 = vmatprep.subr.bf16.mxu0 %v749_v17  ;;  %690 = vmatpush3.bf16.msra.mxu1 %v771_v22 }
  0x73   :  { %691 = vmatprep.subr.bf16.mxu1 %v954_v0  ;;  %p923_p2 = pnand %p922_p1, %p916_p12 }
  0x75   :  { %322 = vmatpush1.bf16.msra.mxu0 %v752_v18 }
  0x76   :  { %323 = vmatprep.subr.bf16.mxu0 %v753_v20  ;;  %692 = vmatpush3.bf16.msra.mxu1 %v775_v25 }
  0x77   :  { %693 = vmatprep.subr.bf16.mxu1 %v954_v0 }
  0x79   :  { %324 = vmatpush1.bf16.msra.mxu0 %v756_v21 }
  0x7a   :  { %325 = vmatprep.subr.bf16.mxu0 %v757_v23  ;;  %694 = vmatpush3.bf16.msra.mxu1 %v779_v30 }
  0x7b   :  { %699 = vmatprep.subr.bf16.mxu1 %v954_v0 }
  0x7d   :  { %326 = vmatpush1.bf16.msra.mxu0 %v760_v24  ;;  %696 = vmatmul.mubr.bf16.vlgmr.msra.gmra.mrb[0].mxu1 %v103_v33 }
  0x7e   :  { %327 = vmatprep.subr.bf16.mxu0 %v761_v27  ;;  %700 = vmatpush3.bf16.msra.mxu1 %v783_v35 }
  0x7f   :  { %701 = vmatprep.subr.bf16.mxu1 %v954_v0  ;;  %715 = vmatprep.mubr.msk.bf16.mxu1 %vm955_vm0, %v954_v0 }
  0x81   :  { %328 = vmatpush1.bf16.msra.mxu0 %v764_v29 }
  0x82   :  { %329 = vmatprep.subr.bf16.mxu0 %v765_v32  ;;  %702 = vmatpush3.bf16.msra.mxu1 %v787_v38 }
  0x83   :  { %703 = vmatprep.subr.bf16.mxu1 %v954_v0 }
  0x85   :  { %330 = vmatpush1.bf16.msra.mxu0 %v768_v34 }
  0x86   :  { %331 = vmatprep.subr.bf16.mxu0 %v769_v36  ;;  %704 = vmatpush3.bf16.msra.mxu1 %v789_v41 }
  0x87   :  { %705 = vmatprep.subr.bf16.mxu1 %v954_v0 }
  0x89   :  { %332 = vmatpush1.bf16.msra.mxu0 %v772_v37 }
  0x8a   :  { %333 = vmatprep.subr.bf16.mxu0 %v773_v39  ;;  %706 = vmatpush3.bf16.msra.mxu1 %v790_v44 }
  0x8b   :  { %707 = vmatprep.subr.bf16.mxu1 %v954_v0 }
  0x8d   :  { %334 = vmatpush1.bf16.msra.mxu0 %v776_v40 }
  0x8e   :  { %335 = vmatprep.subr.bf16.mxu0 %v777_v42  ;;  %708 = vmatpush3.bf16.msra.mxu1 %v791_v47 }
  0x8f   :  { %709 = vmatprep.subr.bf16.mxu1 %v954_v0 }
  0x91   :  { %336 = vmatpush1.bf16.msra.mxu0 %v780_v43 }
  0x92   :  { %337 = vmatprep.subr.bf16.mxu0 %v781_v45  ;;  %710 = vmatpush3.bf16.msra.mxu1 %v792_v50 }
  0x93   :  { %711 = vmatprep.subr.bf16.mxu1 %v954_v0 }
  0x95   :  { %338 = vmatpush1.bf16.msra.mxu0 %v784_v46 }
  0x96   :  { %339 = vmatprep.subr.bf16.mxu0 %v785_v48  ;;  %712 = vmatpush3.bf16.msra.mxu1 %v793_v51 }
  0x97   :  { %713 = vmatprep.subr.bf16.mxu1 %v954_v0 }
  0x99   :  { %340 = vmatpush1.bf16.msra.mxu0 %v788_v49 }
  0x9a   :  { %714 = vmatpush3.bf16.msra.mxu1 %v794_v52 }
  0x9c   :  { %342 = vmatmul.mubr.bf16.vlgmr.msra.gmra.mrb[0].mxu0 %v103_v33 }
  0x9d   :  { %716 = vmatmul.mubr.bf16.vlgmr.msra.gmra.mrb[4].mxu1 %v104_v28 }
 0x150   :  { %v483_v53 = vpop.f32.mrb[0].mxu1 }
 0x151   :  { %v697_v54 = vpop.f32.mrb[1].mxu1  ;;  %v484_v19 = vadd.f32 %v643_v16, %v483_v53 }
 0x152   :  { %v486_v55 = vpop.f32.mrb[2].mxu1 }
 0x153   :  { %v698_v56 = vpop.f32.mrb[3].mxu1 }
 0x16f   :  { %v343_v62 = vpop.f32.mrb[0].mxu0 }
 0x170   :  { %v344_v63 = vadd.f32 %v343_v62, %v142_v61  ;;  %v345_v2 = vpop.f32.mrb[1].mxu0  ;;  %v578_v6 = vpop.f32.mrb[4].mxu1 }
 0x171   :  { %v347_v3 = vpop.f32.mrb[2].mxu0  ;;  %v346_v7 = vadd.f32 %v345_v2, %v146_v5  ;;  %v717_v8 = vpop.f32.mrb[5].mxu1  ;;  %v579_v15 = vadd.f32 %v652_v14, %v578_v6 }
 0x172   :  { %v641_v0 = vmul.f32 -1.442695, %v344_v63  ;;  %v348_v4 = vpop.f32.mrb[3].mxu0  ;;  %v581_v9 = vpop.f32.mrb[6].mxu1 }
 0x173   :  { %v718_v10 = vpop.f32.mrb[7].mxu1  ;;  %v642_v11 = vmul.f32 -1.442695, %v346_v7 }
 0x174   :  { %795 = vpow2.f32 %v641_v0 }
 0x175   :  { %797 = vpow2.f32 %v642_v11 }
 0x17e   :  { %v796_v12 = vpop.eup %795 }
 0x17f   :  { %v353_v13 = vadd.f32 1.0, %v796_v12  ;;  %v798_v17 = vpop.eup %797 }
 0x180   :  { %v359_v21 = vadd.f32 1.0, %v798_v17 }
 0x181   :  { %799 = vrcp.f32 %v353_v13 }
 0x18b   :  { %v800_v18 = vpop.eup %799 }
 0x18c   :  { %v584_v20 = vmul.f32 %v800_v18, %v579_v15 }
 0x18e   :  { %v585_v22 = vadd.f32 %v584_v20, %v484_v19 }
 0x190   :  { %801 = vtanh.f32 %v585_v22 }
 0x191   :  { %803 = vrcp.f32 %v359_v21 }
 0x19a   :  { %v802_v23 = vpop.eup %801 }
 0x19b   :  { %v587_v24 = vsub.f32 %v1090_v26, %v802_v23  ;;  %v804_v25 = vpop.eup %803 }
 0x19d   :  { %v588_v27 = vmul.f32 %v804_v25, %v587_v24 }
 0x19f   :  { %v589_v28 = vadd.f32 %v802_v23, %v588_v27 }
 0x1a1   :  { %591 = vst [vmem:[#allocation12] sm:$0xff] %v589_v28 }
 0x1a2   :  { %926 = shalt.err (!%p923_p2)
}
 0x1a3   :  { %s927_s26 = scalar_lea.hbm %s1136_s8, 128 }
 0x1a4   :  { %p928_p3 = scmp.ne.s32.totalorder %s1136_s8, %s927_s26  ;;  %p931_p4 = scmp.lt.u32.totalorder %s927_s26, %s1136_s8 }
 0x1a6   :  { %p933_p5 = pnand %p931_p4, %p928_p3 }
 0x1a8   :  { %936 = shalt.err (!%p933_p5)
}
 0x1a9   :  { %601 = dma.vmem_to_hbm [thread:$0]  %s599_s24, 128, %s1136_s8, [#allocation5]  }
 0x1aa   :  { %943 = dma.done.wait [#allocation5], 128  }
 0x1ab   :  { %944 = vsyncadd [#allocation5], 4294967168 }
 0x1ac   :  { %605 = vsyncpa [#allocation4], 1 }
 0x1ad   :  { %606 = vsyncpa [#allocation7], 1 }
 0x1ae   :  { %607 = vsyncpa [#allocation10], 1 }
 0x1af   :  { %608 = vsyncpa [#allocation5], 1 }

</bundles_post_ra>
